<compile_context>
chip_gen: v6e
topology: v6e:2x2x1
jax: 0.10.0
libtpu: 0.0.40
codegen_flags: <defaults>
</compile_context>

<pallas_src>
import math

import jax
import jax.numpy as jnp
from jax.experimental import pallas as pl
from jax.experimental.pallas import tpu as pltpu


# ----------------------------------------------------------------------------
# Pallas kernels
# ----------------------------------------------------------------------------

def _front_kernel(x_ref, wt_ref, b_ref, o_ref):
    # x_ref: (TM, INp), wt_ref: (INp, OUTp) (pre-transposed weight),
    # b_ref: (1, OUTp), o_ref: (TM, OUTp)
    acc = jnp.dot(x_ref[...], wt_ref[...], preferred_element_type=jnp.float32)
    o_ref[...] = (acc + b_ref[...].astype(jnp.float32)).astype(o_ref.dtype)


def _back_kernel(x_ref, b_ref, m_ref, o_ref):
    # x_ref: (TM, OUTp), b_ref: (1, OUTp), m_ref: (OUTp, INp), o_ref: (TM, INp)
    shifted = x_ref[...] - b_ref[...]
    o_ref[...] = jnp.dot(
        shifted, m_ref[...], preferred_element_type=jnp.float32
    ).astype(o_ref.dtype)


# ----------------------------------------------------------------------------
# Helpers
# ----------------------------------------------------------------------------

def _round_up(x, m):
    return ((x + m - 1) // m) * m


def _pad2(a, rows, cols):
    r, c = a.shape
    if r == rows and c == cols:
        return a
    return jnp.pad(a, ((0, rows - r), (0, cols - c)))


def _choose_tm(M, tm_max):
    # largest multiple-of-8 tile <= tm_max (tiny inputs get a single tile)
    return min(tm_max, _round_up(M, 8))


def precompute_back_projection(weight):
    """Right pseudo-inverse projection matrix: W @ inv(W.T @ W), shape (out, in).

    Computed with a solve (better conditioned than an explicit inverse).
    Callers with a static weight should cache the result and pass it to
    duplex_linear_back to avoid re-doing this glue every forward call.
    """
    w = weight.T                          # (in, out)
    gram = w @ w.T                        # (in, in)  == W.T @ W
    return jnp.linalg.solve(gram, w).T    # (out, in) == w.T @ inv(gram)


# ----------------------------------------------------------------------------
# Wrappers
# ----------------------------------------------------------------------------

def duplex_linear_front(x, weight, bias, *, tm_max=1024):
    """x: (B, S, in) -> (B, S, out);  computes x @ W.T + b."""
    B, S, IN = x.shape
    OUT, IN_w = weight.shape
    assert IN == IN_w
    M = B * S

    INp = _round_up(IN, 128)
    OUTp = _round_up(OUT, 128)
    tm = _choose_tm(M, tm_max)
    grid_m = pl.cdiv(M, tm)
    Mp = grid_m * tm

    x2 = _pad2(x.reshape(M, IN), Mp, INp)
    wt = _pad2(weight.T, INp, OUTp)          # pre-transposed, padded once
    b2 = _pad2(bias.reshape(1, OUT), 1, OUTp)

    itemsize = jnp.dtype(x.dtype).itemsize
    bytes_accessed = (x2.size + wt.size + b2.size + Mp * OUTp) * itemsize

    out = pl.pallas_call(
        _front_kernel,
        out_shape=jax.ShapeDtypeStruct((Mp, OUTp), x.dtype),
        grid_spec=pltpu.PrefetchScalarGridSpec(
            num_scalar_prefetch=0,
            grid=(grid_m,),
            in_specs=[
                pl.BlockSpec((tm, INp), lambda i: (i, 0)),
                pl.BlockSpec((INp, OUTp), lambda i: (0, 0)),
                pl.BlockSpec((1, OUTp), lambda i: (0, 0)),
            ],
            out_specs=pl.BlockSpec((tm, OUTp), lambda i: (i, 0)),
        ),
        compiler_params=pltpu.CompilerParams(
            dimension_semantics=("parallel",)
        ),
        cost_estimate=pl.CostEstimate(
            flops=2 * Mp * INp * OUTp,
            transcendentals=0,
            bytes_accessed=bytes_accessed,
        ),
    )(x2, wt, b2)
    return out[:M, :OUT].reshape(B, S, OUT)


def duplex_linear_back(x, weight, bias, w_inv_r=None, *, tm_max=1024):
    """x: (B, S, out) -> (B, S, in);  computes (x - b) @ (W @ inv(W.T @ W))."""
    B, S, OUT = x.shape
    OUT_w, IN = weight.shape
    assert OUT == OUT_w
    M = B * S

    # TODO(synk): matrix inverse / solve has no Pallas TPU equivalent; the
    # small (in, in) Gram solve is plain JAX glue (cache it via
    # precompute_back_projection for static weights).
    if w_inv_r is None:
        w_inv_r = precompute_back_projection(weight)   # (out, in)

    INp = _round_up(IN, 128)
    OUTp = _round_up(OUT, 128)
    tm = _choose_tm(M, tm_max)
    grid_m = pl.cdiv(M, tm)
    Mp = grid_m * tm

    x2 = _pad2(x.reshape(M, OUT), Mp, OUTp)
    b2 = _pad2(bias.reshape(1, OUT), 1, OUTp)
    m2 = _pad2(w_inv_r, OUTp, INp)

    itemsize = jnp.dtype(x.dtype).itemsize
    bytes_accessed = (x2.size + b2.size + m2.size + Mp * INp) * itemsize

    out = pl.pallas_call(
        _back_kernel,
        out_shape=jax.ShapeDtypeStruct((Mp, INp), x.dtype),
        grid_spec=pltpu.PrefetchScalarGridSpec(
            num_scalar_prefetch=0,
            grid=(grid_m,),
            in_specs=[
                pl.BlockSpec((tm, OUTp), lambda i: (i, 0)),
                pl.BlockSpec((1, OUTp), lambda i: (0, 0)),
                pl.BlockSpec((OUTp, INp), lambda i: (0, 0)),
            ],
            out_specs=pl.BlockSpec((tm, INp), lambda i: (i, 0)),
        ),
        compiler_params=pltpu.CompilerParams(
            dimension_semantics=("parallel",)
        ),
        cost_estimate=pl.CostEstimate(
            flops=2 * Mp * OUTp * INp,
            transcendentals=0,
            bytes_accessed=bytes_accessed,
        ),
    )(x2, b2, m2)
    return out[:M, :IN].reshape(B, S, IN)


def duplex_linear(front, x, weight, bias):
    if front:
        return duplex_linear_front(x, weight, bias)
    return duplex_linear_back(x, weight, bias)


# ----------------------------------------------------------------------------
# Deterministic parameter init (matches nn.Linear / DuplexLinear semantics)
# ----------------------------------------------------------------------------

def init_params(key, in_features, out_features):
    kw, kb = jax.random.split(key)
    # kaiming_uniform_(a=sqrt(5)) on a (out, in) weight -> U(-1/sqrt(fan_in), +)
    bound_w = 1.0 / math.sqrt(in_features)
    weight = jax.random.uniform(
        kw, (out_features, in_features), jnp.float32, -bound_w, bound_w
    )
    bound_b = 1.0 / math.sqrt(in_features)
    bias = jax.random.uniform(
        kb, (out_features,), jnp.float32, -bound_b, bound_b
    )
    return weight, bias


# ----------------------------------------------------------------------------
# Main
# ----------------------------------------------------------------------------

if __name__ == "__main__":
    IN_FEATURES = 32
    OUT_FEATURES = 64
    B, S = 2, 8

    key = jax.random.PRNGKey(0)
    kp, kx, ky, kz = jax.random.split(key, 4)
    weight, bias = init_params(kp, IN_FEATURES, OUT_FEATURES)

    x_front = jax.random.normal(kx, (B, S, IN_FEATURES), jnp.float32)
    x_back = jax.random.normal(ky, (B, S, OUT_FEATURES), jnp.float32)

    # forward_front
    y_front = duplex_linear(True, x_front, weight, bias)
    y_front = jax.block_until_ready(y_front)

    # forward_back
    y_back = duplex_linear(False, x_back, weight, bias)
    y_back = jax.block_until_ready(y_back)

    # Reference checks in plain JAX (same math as the PyTorch module;
    # pseudo-inverse built with a solve, mathematically identical to inverse).
    ref_front = x_front @ weight.T + bias
    w_inv_r = precompute_back_projection(weight)
    ref_back = (x_back - bias[None, None, :]) @ w_inv_r

    assert y_front.shape == (B, S, OUT_FEATURES)
    assert y_back.shape == (B, S, IN_FEATURES)
    assert jnp.allclose(y_front, ref_front, atol=1e-5, rtol=1e-5)
    assert jnp.allclose(y_back, ref_back, atol=1e-4, rtol=1e-4)

    # Odd-sized token count to exercise the cdiv + row-padding path.
    B2, S2 = 3, 5
    x_odd = jax.random.normal(kz, (B2, S2, IN_FEATURES), jnp.float32)
    y_odd = jax.block_until_ready(duplex_linear(True, x_odd, weight, bias))
    assert y_odd.shape == (B2, S2, OUT_FEATURES)
    assert jnp.allclose(y_odd, x_odd @ weight.T + bias, atol=1e-5, rtol=1e-5)

    print("KERNEL_OK")
</pallas_src>

<mosaic_0001>
module attributes {stable_mosaic.version = 11 : i64} {
  func.func @_front_kernel(%arg0: i32, %arg1: memref<16x128xf32, #tpu.memory_space<vmem>>, %arg2: memref<128x128xf32, #tpu.memory_space<vmem>>, %arg3: memref<1x128xf32, #tpu.memory_space<vmem>>, %arg4: memref<16x128xf32, #tpu.memory_space<vmem>>) attributes {dimension_semantics = [#tpu.dimension_semantics<parallel>], iteration_bounds = array<i64: 1>, scalar_prefetch = 0 : i64, scratch_operands = 0 : i64, tpu.core_type = #tpu.core_type<tc>, window_params = [{transform_indices = @transform_0, window_bounds = array<i64: 16, 128>}, {pipeline_mode = #tpu.pipeline_mode<synchronous>, transform_indices = @transform_1, window_bounds = array<i64: 128, 128>}, {pipeline_mode = #tpu.pipeline_mode<synchronous>, transform_indices = @transform_2, window_bounds = array<i64: 1, 128>}, {transform_indices = @transform_3, window_bounds = array<i64: 16, 128>}]} {
    %c0 = arith.constant 0 : index
    %c0_0 = arith.constant 0 : index
    %0 = vector.load %arg1[%c0, %c0_0] : memref<16x128xf32, #tpu.memory_space<vmem>>, vector<16x128xf32>
    %c0_1 = arith.constant 0 : index
    %c0_2 = arith.constant 0 : index
    %1 = vector.load %arg2[%c0_1, %c0_2] : memref<128x128xf32, #tpu.memory_space<vmem>>, vector<128x128xf32>
    %cst = arith.constant dense<0.000000e+00> : vector<16x128xf32>
    %2 = tpu.matmul %0, %1, %cst {dimension_numbers = #tpu.dot_dimension_numbers<[1], [0], [0], [1], [0, 0, 1, 1], [], []>} : vector<16x128xf32>, vector<128x128xf32>, vector<16x128xf32> -> vector<16x128xf32>
    %c0_3 = arith.constant 0 : index
    %c0_4 = arith.constant 0 : index
    %3 = vector.load %arg3[%c0_3, %c0_4] : memref<1x128xf32, #tpu.memory_space<vmem>>, vector<1x128xf32>
    %4 = vector.broadcast %3 : vector<1x128xf32> to vector<16x128xf32>
    %5 = arith.addf %2, %4 : vector<16x128xf32>
    %c0_5 = arith.constant 0 : index
    %c0_6 = arith.constant 0 : index
    %6 = vector.load %arg4[%c0_5, %c0_6] : memref<16x128xf32, #tpu.memory_space<vmem>>, vector<16x128xf32>
    tpu.vector_store %arg4[%c0_5, %c0_6], %5 {strides = array<i32>} : memref<16x128xf32, #tpu.memory_space<vmem>>, vector<16x128xf32>,
    return
  }
  func.func @transform_0(%arg0: i32) -> (i32, i32) {
    %c0_i32 = arith.constant 0 : i32
    %c0_i32_0 = arith.constant 0 : i32
    return %arg0, %c0_i32 : i32, i32
  }
  func.func @transform_1(%arg0: i32) -> (i32, i32) {
    %c0_i32 = arith.constant 0 : i32
    %c0_i32_0 = arith.constant 0 : i32
    %c0_i32_1 = arith.constant 0 : i32
    return %c0_i32, %c0_i32_0 : i32, i32
  }
  func.func @transform_2(%arg0: i32) -> (i32, i32) {
    %c0_i32 = arith.constant 0 : i32
    %c0_i32_0 = arith.constant 0 : i32
    %c0_i32_1 = arith.constant 0 : i32
    return %c0_i32, %c0_i32_0 : i32, i32
  }
  func.func @transform_3(%arg0: i32) -> (i32, i32) {
    %c0_i32 = arith.constant 0 : i32
    %c0_i32_0 = arith.constant 0 : i32
    return %arg0, %c0_i32 : i32, i32
  }
}

</mosaic_0001>

<bundles_post_ra>
// kernel: tpu_custom_call.1
= control target key start
LH: loop header
LB: loop body
LE: loop exit
PB: predicated region body
PF: predicated region fallthrough
CT: control target
= control target key end

     0   :  { %8 = vsyncpa [#allocation3], 0  ;;  %s334_s0 = inlined_call_operand.hbm [shape: f32[16,128], index: 0, kind: input, shape index: {}]   ;;  %s335_s1 = inlined_call_operand.hbm [shape: f32[128,128], index: 1, kind: input, shape index: {}]   ;;  %s336_s2 = inlined_call_operand.vmem [shape: f32[1,128], index: 2, kind: input, shape index: {}]   ;;  %s337_s3 = inlined_call_operand.hbm [shape: f32[16,128], index: 3, kind: output, shape index: {}]  }
   0x1   :  { %9 = vsyncpa [#allocation6], 0 }
   0x2   :  { %10 = vsyncpa [#allocation4], 0  ;;  %s288_s12 = smov [#allocation2]  }
   0x3   :  { %s16_s13 = sshll.u32 %s288_s12, 4  ;;  %s17_s13 = int_to_ptr.vmem [resolvable:$true] %s16_s13 }
   0x4   :  { %s230_s14 = scalar_lea.vmem %s17_s13, 256  ;;  %p235_p1 = scmp.lt.s32.totalorder %s17_s13, %s17_s13 }
   0x5   :  { %p231_p0 = scmp.ne.s32.totalorder %s17_s13, %s230_s14  ;;  %p236_p2 = scmp.lt.s32.totalorder %s230_s14, %s230_s14 }
   0x7   :  { %p237_p3 = por %p236_p2, %p235_p1 }
   0x9   :  { %p238_p4 = pnand %p237_p3, %p231_p0 }
   0xb   :  { %241 = shalt.err (!%p238_p4)
}
   0xc   :  { %s289_s15 = smov 128   ;;  %s290_s16 = smov 8  }
   0xd   :  { %22 = dma.hbm_to_vmem [thread:$0]  %s334_s0, 256, %s17_s13, [#allocation3], %s289_s15, %s289_s15, %s290_s16  }
   0xe   :  { %s291_s19 = smov [#allocation5]  }
   0xf   :  { %s28_s20 = sshll.u32 %s291_s19, 4  ;;  %s29_s20 = int_to_ptr.vmem [resolvable:$true] %s28_s20 }
  0x10   :  { %s250_s21 = scalar_lea.vmem %s29_s20, 2048  ;;  %p255_p6 = scmp.lt.s32.totalorder %s29_s20, %s29_s20 }
  0x11   :  { %p251_p5 = scmp.ne.s32.totalorder %s29_s20, %s250_s21  ;;  %p256_p7 = scmp.lt.s32.totalorder %s250_s21, %s250_s21 }
  0x13   :  { %p257_p8 = por %p256_p7, %p255_p6 }
  0x15   :  { %p258_p9 = pnand %p257_p8, %p251_p5 }
  0x17   :  { %261 = shalt.err (!%p258_p9)
}
  0x18   :  { %34 = dma.hbm_to_vmem [thread:$0]  %s335_s1, 2048, %s29_s20, [#allocation6], %s289_s15, %s289_s15, %s290_s16  }
  0x19   :  { %282 = dma.done.wait [#allocation3], 256  }
  0x1a   :  { %283 = vsyncadd [#allocation3], 4294967040 }
  0x1b   :  { %284 = dma.done.wait [#allocation6], 2048  }
  0x1c   :  { %285 = vsyncadd [#allocation6], 4294965248  ;;  %v60_v0 = vld [vmem:[#allocation5 + $0x78] sm:$0xff]  ;;  %v59_v1 = vld [vmem:[#allocation5 + $0x70] sm:$0xff]  ;;  %s292_s24 = smov [#allocation7]  }
  0x1d   :  { %182 = vmatprep.subr.mxu0 %v60_v0  ;;  %v58_v2 = vld [vmem:[#allocation5 + $0x68] sm:$0xff]  ;;  %v57_v3 = vld [vmem:[#allocation5 + $0x60] sm:$0xff]  ;;  %v43_v4 = vld [vmem:[#allocation2] sm:$0xff]  ;;  %s150_s25 = sshll.u32 %s292_s24, 4  ;;  %s151_s25 = int_to_ptr.vmem [resolvable:$true] %s150_s25 }
  0x1e   :  { %183 = vmatpush3.msra.mxu0 %v60_v0  ;;  %v56_v5 = vld [vmem:[#allocation5 + $0x58] sm:$0xff]  ;;  %214 = vmatprep.mubr.f32.mxu0 %v43_v4  ;;  %v55_v6 = vld [vmem:[#allocation5 + $0x50] sm:$0xff]  ;;  %v54_v7 = vld [vmem:[#allocation5 + $0x48] sm:$0xff]  ;;  %s262_s26 = scalar_lea.vmem %s151_s25, 256  ;;  %p267_p11 = scmp.lt.s32.totalorder %s151_s25, %s151_s25 }
  0x1f   :  { %184 = vmatprep.subr.mxu0 %v59_v1  ;;  %v53_v8 = vld [vmem:[#allocation5 + $0x40] sm:$0xff]  ;;  %v52_v9 = vld [vmem:[#allocation5 + $0x38] sm:$0xff]  ;;  %v51_v10 = vld [vmem:[#allocation5 + $0x30] sm:$0xff]  ;;  %p263_p10 = scmp.ne.s32.totalorder %s151_s25, %s262_s26  ;;  %p268_p12 = scmp.lt.s32.totalorder %s262_s26, %s262_s26 }
  0x20   :  { %185 = vmatpush3.msra.mxu0 %v59_v1  ;;  %v50_v11 = vld [vmem:[#allocation5 + $0x28] sm:$0xff]  ;;  %v49_v12 = vld [vmem:[#allocation5 + $0x20] sm:$0xff]  ;;  %v48_v13 = vld [vmem:[#allocation5 + $0x18] sm:$0xff] }
  0x21   :  { %186 = vmatprep.subr.mxu0 %v58_v2  ;;  %v47_v14 = vld [vmem:[#allocation5 + $0x10] sm:$0xff]  ;;  %v46_v15 = vld [vmem:[#allocation5 + $0x8] sm:$0xff]  ;;  %v45_v16 = vld [vmem:[#allocation5] sm:$0xff]  ;;  %p269_p13 = por %p268_p12, %p267_p11 }
  0x22   :  { %187 = vmatpush3.msra.mxu0 %v58_v2  ;;  %v44_v17 = vld [vmem:[#allocation2 + $0x8] sm:$0xff]  ;;  %v163_v18 = vld [vmem:[%s336_s2] ss:$0 sm:$0xff] }
  0x23   :  { %188 = vmatprep.subr.mxu0 %v57_v3  ;;  %p270_p0 = pnand %p269_p13, %p263_p10 }
  0x24   :  { %189 = vmatpush3.msra.mxu0 %v57_v3 }
  0x25   :  { %190 = vmatprep.subr.mxu0 %v56_v5 }
  0x26   :  { %191 = vmatpush3.msra.mxu0 %v56_v5 }
  0x27   :  { %192 = vmatprep.subr.mxu0 %v55_v6 }
  0x28   :  { %193 = vmatpush3.msra.mxu0 %v55_v6 }
  0x29   :  { %194 = vmatprep.subr.mxu0 %v54_v7 }
  0x2a   :  { %195 = vmatpush3.msra.mxu0 %v54_v7 }
  0x2b   :  { %196 = vmatprep.subr.mxu0 %v53_v8 }
  0x2c   :  { %197 = vmatpush3.msra.mxu0 %v53_v8 }
  0x2d   :  { %198 = vmatprep.subr.mxu0 %v52_v9 }
  0x2e   :  { %199 = vmatpush3.msra.mxu0 %v52_v9 }
  0x2f   :  { %200 = vmatprep.subr.mxu0 %v51_v10 }
  0x30   :  { %201 = vmatpush3.msra.mxu0 %v51_v10 }
  0x31   :  { %202 = vmatprep.subr.mxu0 %v50_v11 }
  0x32   :  { %203 = vmatpush3.msra.mxu0 %v50_v11 }
  0x33   :  { %204 = vmatprep.subr.mxu0 %v49_v12 }
  0x34   :  { %205 = vmatpush3.msra.mxu0 %v49_v12 }
  0x35   :  { %206 = vmatprep.subr.mxu0 %v48_v13 }
  0x36   :  { %207 = vmatpush3.msra.mxu0 %v48_v13 }
  0x37   :  { %208 = vmatprep.subr.mxu0 %v47_v14 }
  0x38   :  { %209 = vmatpush3.msra.mxu0 %v47_v14 }
  0x39   :  { %210 = vmatprep.subr.mxu0 %v46_v15 }
  0x3a   :  { %211 = vmatpush3.msra.mxu0 %v46_v15 }
  0x3b   :  { %212 = vmatprep.subr.mxu0 %v45_v16 }
  0x3c   :  { %213 = vmatpush3.msra.mxu0 %v45_v16 }
  0x3d   :  { %215 = vmatmul.mubr.f32.vlgmr.msra.gmra.mxu0 %v44_v17 }
  0xfd   :  { %v216_v19 = vpop.f32.mrf.mxu0 }
  0xfe   :  { %v140_v20 = vadd.f32 %v216_v19, %v163_v18 }
  0xff   :  { %v134_v21 = vpop.f32.mrf.mxu0 }
 0x100   :  { %144 = vst [vmem:[#allocation7 + $0x8] sm:$0xff] %v140_v20  ;;  %v135_v22 = vadd.f32 %v163_v18, %v134_v21 }
 0x102   :  { %143 = vst [vmem:[#allocation7] sm:$0xff] %v135_v22 }
 0x103   :  { %273 = shalt.err (!%p270_p0)
}
 0x104   :  { %156 = dma.vmem_to_hbm [thread:$0]  %s151_s25, 256, %s337_s3, [#allocation4], %s289_s15, %s289_s15, %s290_s16  }
 0x105   :  { %286 = dma.done.wait [#allocation4], 256  }
 0x106   :  { %287 = vsyncadd [#allocation4], 4294967040 }
 0x107   :  { %160 = vsyncpa [#allocation3], 1 }
 0x108   :  { %161 = vsyncpa [#allocation6], 1 }
 0x109   :  { %162 = vsyncpa [#allocation4], 1 }

</bundles_post_ra>
